<compile_context>
chip_gen: v6e
topology: v6e:2x2x1
jax: 0.10.0
libtpu: 0.0.40
codegen_flags: <defaults>
</compile_context>

<pallas_src>
import functools

import numpy as np
import jax
import jax.numpy as jnp
from jax import lax
from jax.experimental import pallas as pl
from jax.experimental.pallas import tpu as pltpu


def _round_up(a, b):
    return (a + b - 1) // b * b


def _cdiv(a, b):
    return (a + b - 1) // b


def _lista_kernel(thr_ref, x_ref, wcat_ref, out_ref, state_scr, *,
                  n_atoms_pad, n_layers, split):
    """One sample tile: run all LISTA layers with VMEM-resident weights.

    thr_ref:   SMEM (1,) f32                       -- soft threshold lmbd / L
    x_ref:     VMEM (TILE_M, D_pad)  compute_dtype
    wcat_ref:  VMEM (L, K_pad, N_pad) compute_dtype, K_pad = N_pad + D_pad
    out_ref:   VMEM (TILE_M, N_pad)  f32
    state_scr: VMEM (TILE_M, K_pad)  compute_dtype -- fused [z | x] operand
    """
    thr = thr_ref[0]
    cdt = state_scr.dtype
    tile_m = out_ref.shape[0]

    # Two independent row halves per layer let the MXU matmul of one half
    # overlap the VPU softshrink + state-store epilogue of the other half.
    if split:
        h = tile_m // 2
        halves = ((0, h), (h, h))
    else:
        halves = ((0, tile_m),)

    def softshrink(p):   # f32 in / f32 out, 3 VPU ops; requires thr >= 0
        return p - jnp.clip(p, -thr, thr)

    # Write the x tile once into the trailing columns of the fused state
    # (x is already in the compute dtype -> plain copy, no per-layer cast).
    state_scr[:, n_atoms_pad:] = x_ref[...]

    # ---- Layer 0: z0 == 0, so only the Wx rows of W_cat[0] contribute. ----
    wx0 = wcat_ref[0, n_atoms_pad:, :]                       # (D_pad, N_pad)
    pres = [jnp.dot(x_ref[pl.ds(r0, rn), :], wx0,
                    preferred_element_type=jnp.float32)
            for r0, rn in halves]
    for (r0, rn), pre in zip(halves, pres):
        z = softshrink(pre)
        if n_layers == 1:                # last layer -> straight to output
            out_ref[pl.ds(r0, rn), :] = z.astype(out_ref.dtype)
        else:
            state_scr[pl.ds(r0, rn), :n_atoms_pad] = z.astype(cdt)
    if n_layers == 1:
        return

    # ---- Layers 1 .. L-2: fused matmul  [z | x] @ [Wz[l]; Wx[l]]. ----
    if n_layers > 2:
        def body(l, carry):
            w_l = wcat_ref[l]                                # (K_pad, N_pad)
            pres = [jnp.dot(state_scr[pl.ds(r0, rn), :], w_l,
                            preferred_element_type=jnp.float32)
                    for r0, rn in halves]
            for (r0, rn), pre in zip(halves, pres):
                state_scr[pl.ds(r0, rn), :n_atoms_pad] = (
                    softshrink(pre).astype(cdt))
            return carry

        lax.fori_loop(1, n_layers - 1, body, 0,
                      unroll=(n_layers - 2) <= 16)

    # ---- Final layer: peeled, z written straight to out_ref. ----
    w_last = wcat_ref[n_layers - 1]
    pres = [jnp.dot(state_scr[pl.ds(r0, rn), :], w_last,
                    preferred_element_type=jnp.float32)
            for r0, rn in halves]
    for (r0, rn), pre in zip(halves, pres):
        out_ref[pl.ds(r0, rn), :] = softshrink(pre).astype(out_ref.dtype)


def lista_forward(x, Wz_stack, Wx_stack, thr, *, tile_m=512,
                  compute_dtype=jnp.bfloat16):
    """x: (n_samples, n_dim); Wz_stack: (L, n_atoms, n_atoms);
    Wx_stack: (L, n_dim, n_atoms); thr = lmbd / L (scalar, >= 0).
    Returns (n_samples, n_atoms) float32.

    compute_dtype is the MXU input dtype for the weights and the fused [z|x]
    state (accumulation + softshrink are always f32).  bfloat16 (default) is
    the native MXU path on v5e/v6e/v7x and halves resident VMEM; the error
    compounds over layers (~1e-3..1e-2 absolute for O(0.1) codes).  Pass
    jnp.float32 for the exact (multi-pass, ~3x slower matmul) path.
    """
    n_layers, n_atoms, _ = Wz_stack.shape
    n_samples, n_dim = x.shape
    if float(thr) < 0:
        raise ValueError("softshrink threshold lmbd / L must be >= 0")

    # Lane/sublane-aligned padded sizes (zero padding is exact here).
    n_atoms_pad = _round_up(n_atoms, 128)
    n_dim_pad = _round_up(n_dim, 128)
    k_pad = n_atoms_pad + n_dim_pad

    # Sample-tile size: multiple of 8; prefer >= 2 grid tiles (v7x: 2 TCs per
    # chip); a multiple of 32 enables the in-kernel sub-tile interleave.
    tile_m = max(8, min(_round_up(tile_m, 8), _round_up(n_samples, 8)))
    if _cdiv(n_samples, tile_m) < 2 and n_samples >= 16:
        cand = _round_up(_cdiv(n_samples, 2), 32)
        tile_m = cand if _cdiv(n_samples, cand) >= 2 else _round_up(
            _cdiv(n_samples, 2), 8)
    split = tile_m % 32 == 0
    n_samples_pad = _round_up(n_samples, tile_m)
    grid = (n_samples_pad // tile_m,)

    # Zero-pad; x and the fused weights go straight to the compute dtype.
    x_pad = jnp.zeros((n_samples_pad, n_dim_pad), compute_dtype)
    x_pad = x_pad.at[:n_samples, :n_dim].set(x.astype(compute_dtype))
    wz_pad = jnp.zeros((n_layers, n_atoms_pad, n_atoms_pad), compute_dtype)
    wz_pad = wz_pad.at[:, :n_atoms, :n_atoms].set(
        Wz_stack.astype(compute_dtype))
    wx_pad = jnp.zeros((n_layers, n_dim_pad, n_atoms_pad), compute_dtype)
    wx_pad = wx_pad.at[:, :n_dim, :n_atoms].set(Wx_stack.astype(compute_dtype))
    # Fused weights: W_cat[l] = [Wz[l]; Wx[l]]  -> (L, K_pad, N_pad)
    w_cat = jnp.concatenate([wz_pad, wx_pad], axis=1)

    thr_arr = jnp.asarray([thr], dtype=jnp.float32)
    w_itemsize = jnp.dtype(compute_dtype).itemsize

    # Generation-aware VMEM ceiling (~54 MiB on v7x, ~108 MiB on v5e/v6e).
    try:
        vmem_cap = int(pltpu.get_tpu_info().vmem_capacity_bytes)
    except Exception:
        vmem_cap = 64 << 20
    vmem_ceiling = max(int(vmem_cap * 0.85), 32 << 20)

    kernel = functools.partial(_lista_kernel, n_atoms_pad=n_atoms_pad,
                               n_layers=n_layers, split=split)

    def run(single_buffer_weights):
        # Constant index_map -> weights fetched once; Buffered(1) drops the
        # useless second weight buffer (halves weight residency on v7x).
        w_kwargs = (dict(pipeline_mode=pl.Buffered(1))
                    if single_buffer_weights else {})
        n_w_bufs = 1 if single_buffer_weights else 2
        vmem_bytes = (2 * tile_m * n_dim_pad * w_itemsize            # x
                      + 2 * tile_m * n_atoms_pad * 4                 # out f32
                      + n_w_bufs * n_layers * k_pad * n_atoms_pad * w_itemsize
                      + tile_m * k_pad * w_itemsize)                 # state
        vmem_limit = min(max(int(1.2 * vmem_bytes) + (4 << 20), 32 << 20),
                         vmem_ceiling)

        grid_spec = pltpu.PrefetchScalarGridSpec(
            num_scalar_prefetch=1,                     # thr lands in SMEM
            grid=grid,
            in_specs=[
                pl.BlockSpec((tile_m, n_dim_pad), lambda m, _t: (m, 0)),
                # Full weight stack, constant block index -> resident.
                pl.BlockSpec((n_layers, k_pad, n_atoms_pad),
                             lambda m, _t: (0, 0, 0), **w_kwargs),
            ],
            out_specs=pl.BlockSpec((tile_m, n_atoms_pad),
                                   lambda m, _t: (m, 0)),
            scratch_shapes=[pltpu.VMEM((tile_m, k_pad), compute_dtype)],
        )
        out = pl.pallas_call(
            kernel,
            out_shape=jax.ShapeDtypeStruct((n_samples_pad, n_atoms_pad),
                                           jnp.float32),
            grid_spec=grid_spec,
            compiler_params=pltpu.CompilerParams(
                dimension_semantics=("parallel",),
                vmem_limit_bytes=vmem_limit,
            ),
        )(thr_arr, x_pad, w_cat)
        return jax.block_until_ready(out)

    try:
        out_pad = run(True)
    except Exception:
        # pl.Buffered single-buffering unavailable in this jax version /
        # config: fall back to the default double-buffered weight pipeline
        # (still only fetched once thanks to the constant index_map).
        out_pad = run(False)

    return out_pad[:n_samples, :n_atoms]


# ----------------------------------------------------------------------------
# Self-test
# ----------------------------------------------------------------------------
def _lista_reference_np(x, Wz_stack, Wx_stack, thr):
    """Float64 numpy reference mirroring the PyTorch forward (z0=None)."""
    x = x.astype(np.float64)
    Wz = Wz_stack.astype(np.float64)
    Wx = Wx_stack.astype(np.float64)

    def softshrink(v, t):
        return np.sign(v) * np.maximum(np.abs(v) - t, 0.0)

    z = softshrink(x @ Wx[0], thr)
    for l in range(1, Wz.shape[0]):
        z = softshrink(z @ Wz[l] + x @ Wx[l], thr)
    return z


def _make_problem(n_atoms, n_dim, n_samples, n_layers, lmbd):
    """Parameters built exactly as in Lista.__init__ / init_network_torch."""
    key = jax.random.PRNGKey(0)
    k_d, k_x = jax.random.split(key)
    D = np.asarray(jax.random.normal(k_d, (n_atoms, n_dim), jnp.float32),
                   dtype=np.float64) / np.sqrt(n_dim)
    x = np.asarray(jax.random.normal(k_x, (n_samples, n_dim), jnp.float32),
                   dtype=np.float32)
    B = D @ D.T
    L = float(np.linalg.norm(B, ord=2))               # spectral norm
    Wz = (np.eye(n_atoms) - B / L).astype(np.float32)
    Wx = (D.T / L).astype(np.float32)
    Wz_stack = np.ascontiguousarray(
        np.broadcast_to(Wz, (n_layers, n_atoms, n_atoms))).astype(np.float32)
    Wx_stack = np.ascontiguousarray(
        np.broadcast_to(Wx, (n_layers, n_dim, n_atoms))).astype(np.float32)
    thr = lmbd / L
    return x, Wz_stack, Wx_stack, thr


if __name__ == "__main__":
    # Small problem: single-tile, no-split path.
    x1, Wz1, Wx1, thr1 = _make_problem(n_atoms=32, n_dim=16, n_samples=8,
                                       n_layers=4, lmbd=0.1)
    ref1 = _lista_reference_np(x1, Wz1, Wx1, thr1)

    z1_f32 = jax.block_until_ready(
        lista_forward(jnp.asarray(x1), jnp.asarray(Wz1), jnp.asarray(Wx1),
                      thr1, compute_dtype=jnp.float32))
    np.testing.assert_allclose(np.asarray(z1_f32), ref1, rtol=1e-4, atol=1e-4)

    z1_bf16 = jax.block_until_ready(
        lista_forward(jnp.asarray(x1), jnp.asarray(Wz1), jnp.asarray(Wx1),
                      thr1))                         # bf16 default MXU path
    np.testing.assert_allclose(np.asarray(z1_bf16), ref1, rtol=0, atol=5e-2)

    # Larger problem: exercises padding (200 -> 256, 64 -> 128), >= 2 grid
    # tiles (megacore) and the split (sub-tile MXU/VPU interleave) path.
    x2, Wz2, Wx2, thr2 = _make_problem(n_atoms=200, n_dim=64, n_samples=300,
                                       n_layers=6, lmbd=0.1)
    ref2 = _lista_reference_np(x2, Wz2, Wx2, thr2)

    z2_f32 = jax.block_until_ready(
        lista_forward(jnp.asarray(x2), jnp.asarray(Wz2), jnp.asarray(Wx2),
                      thr2, compute_dtype=jnp.float32))
    np.testing.assert_allclose(np.asarray(z2_f32), ref2, rtol=1e-4, atol=1e-4)

    z2_bf16 = jax.block_until_ready(
        lista_forward(jnp.asarray(x2), jnp.asarray(Wz2), jnp.asarray(Wx2),
                      thr2))
    np.testing.assert_allclose(np.asarray(z2_bf16), ref2, rtol=0, atol=5e-2)

    print("KERNEL_OK")
</pallas_src>

<mosaic_0001>
module attributes {stable_mosaic.version = 11 : i64} {
  func.func @_lista_kernel(%arg0: i32, %arg1: memref<1xf32, #tpu.memory_space<smem>>, %arg2: memref<8x128xf32, #tpu.memory_space<vmem>>, %arg3: memref<4x256x128xf32, #tpu.memory_space<vmem>>, %arg4: memref<8x128xf32, #tpu.memory_space<vmem>>, %arg5: memref<8x256xf32, #tpu.memory_space<vmem>>) attributes {dimension_semantics = [#tpu.dimension_semantics<parallel>], iteration_bounds = array<i64: 1>, scalar_prefetch = 1 : i64, scratch_operands = 1 : i64, tpu.core_type = #tpu.core_type<tc>, window_params = [{transform_indices = @transform_0, window_bounds = array<i64: 8, 128>}, {pipeline_mode = #tpu.pipeline_mode<synchronous>, transform_indices = @transform_1, window_bounds = array<i64: 4, 256, 128>}, {transform_indices = @transform_2, window_bounds = array<i64: 8, 128>}]} {
    %c0 = arith.constant 0 : index
    %0 = memref.load %arg1[%c0] : memref<1xf32, #tpu.memory_space<smem>>
    %c0_0 = arith.constant 0 : index
    %c0_1 = arith.constant 0 : index
    %1 = vector.load %arg2[%c0_0, %c0_1] : memref<8x128xf32, #tpu.memory_space<vmem>>, vector<8x128xf32>
    %c0_2 = arith.constant 0 : index
    %c128 = arith.constant 128 : index
    %2 = vector.load %arg5[%c0_2, %c128] : memref<8x256xf32, #tpu.memory_space<vmem>>, vector<8x128xf32>
    tpu.vector_store %arg5[%c0_2, %c128], %1 {strides = array<i32>} : memref<8x256xf32, #tpu.memory_space<vmem>>, vector<8x128xf32>,
    %c0_3 = arith.constant 0 : index
    %c128_4 = arith.constant 128 : index
    %c0_5 = arith.constant 0 : index
    %3 = vector.load %arg3[%c0_3, %c128_4, %c0_5] : memref<4x256x128xf32, #tpu.memory_space<vmem>>, vector<1x128x128xf32>
    %4 = vector.shape_cast %3 : vector<1x128x128xf32> to vector<128x128xf32>
    %c0_6 = arith.constant 0 : index
    %c0_7 = arith.constant 0 : index
    %5 = vector.load %arg2[%c0_6, %c0_7] : memref<8x128xf32, #tpu.memory_space<vmem>>, vector<8x128xf32>
    %cst = arith.constant dense<0.000000e+00> : vector<8x128xf32>
    %6 = tpu.matmul %5, %4, %cst {dimension_numbers = #tpu.dot_dimension_numbers<[1], [0], [0], [1], [0, 0, 1, 1], [], []>} : vector<8x128xf32>, vector<128x128xf32>, vector<8x128xf32> -> vector<8x128xf32>
    %cst_8 = arith.constant 0.000000e+00 : f32
    %7 = arith.subf %cst_8, %0 : f32
    %8 = vector.broadcast %7 : f32 to vector<8x128xf32>
    %9 = arith.maximumf %8, %6 : vector<8x128xf32>
    %10 = vector.broadcast %0 : f32 to vector<8x128xf32>
    %11 = arith.minimumf %10, %9 : vector<8x128xf32>
    %12 = arith.subf %6, %11 : vector<8x128xf32>
    %c0_9 = arith.constant 0 : index
    %c0_10 = arith.constant 0 : index
    %13 = vector.load %arg5[%c0_9, %c0_10] : memref<8x256xf32, #tpu.memory_space<vmem>>, vector<8x128xf32>
    tpu.vector_store %arg5[%c0_9, %c0_10], %12 {strides = array<i32>} : memref<8x256xf32, #tpu.memory_space<vmem>>, vector<8x128xf32>,
    %c1_i32 = arith.constant 1 : i32
    %14 = arith.index_cast %c1_i32 : i32 to index
    %c0_11 = arith.constant 0 : index
    %c0_12 = arith.constant 0 : index
    %15 = vector.load %arg3[%14, %c0_11, %c0_12] : memref<4x256x128xf32, #tpu.memory_space<vmem>>, vector<1x256x128xf32>
    %16 = vector.shape_cast %15 : vector<1x256x128xf32> to vector<256x128xf32>
    %c0_13 = arith.constant 0 : index
    %c0_14 = arith.constant 0 : index
    %17 = vector.load %arg5[%c0_13, %c0_14] : memref<8x256xf32, #tpu.memory_space<vmem>>, vector<8x256xf32>
    %cst_15 = arith.constant dense<0.000000e+00> : vector<8x128xf32>
    %18 = tpu.matmul %17, %16, %cst_15 {dimension_numbers = #tpu.dot_dimension_numbers<[1], [0], [0], [1], [0, 0, 1, 1], [], []>} : vector<8x256xf32>, vector<256x128xf32>, vector<8x128xf32> -> vector<8x128xf32>
    %cst_16 = arith.constant 0.000000e+00 : f32
    %19 = arith.subf %cst_16, %0 : f32
    %20 = vector.broadcast %19 : f32 to vector<8x128xf32>
    %21 = arith.maximumf %20, %18 : vector<8x128xf32>
    %22 = vector.broadcast %0 : f32 to vector<8x128xf32>
    %23 = arith.minimumf %22, %21 : vector<8x128xf32>
    %24 = arith.subf %18, %23 : vector<8x128xf32>
    %c0_17 = arith.constant 0 : index
    %c0_18 = arith.constant 0 : index
    %25 = vector.load %arg5[%c0_17, %c0_18] : memref<8x256xf32, #tpu.memory_space<vmem>>, vector<8x128xf32>
    tpu.vector_store %arg5[%c0_17, %c0_18], %24 {strides = array<i32>} : memref<8x256xf32, #tpu.memory_space<vmem>>, vector<8x128xf32>,
    %c2_i32 = arith.constant 2 : i32
    %26 = arith.index_cast %c2_i32 : i32 to index
    %c0_19 = arith.constant 0 : index
    %c0_20 = arith.constant 0 : index
    %27 = vector.load %arg3[%26, %c0_19, %c0_20] : memref<4x256x128xf32, #tpu.memory_space<vmem>>, vector<1x256x128xf32>
    %28 = vector.shape_cast %27 : vector<1x256x128xf32> to vector<256x128xf32>
    %c0_21 = arith.constant 0 : index
    %c0_22 = arith.constant 0 : index
    %29 = vector.load %arg5[%c0_21, %c0_22] : memref<8x256xf32, #tpu.memory_space<vmem>>, vector<8x256xf32>
    %cst_23 = arith.constant dense<0.000000e+00> : vector<8x128xf32>
    %30 = tpu.matmul %29, %28, %cst_23 {dimension_numbers = #tpu.dot_dimension_numbers<[1], [0], [0], [1], [0, 0, 1, 1], [], []>} : vector<8x256xf32>, vector<256x128xf32>, vector<8x128xf32> -> vector<8x128xf32>
    %cst_24 = arith.constant 0.000000e+00 : f32
    %31 = arith.subf %cst_24, %0 : f32
    %32 = vector.broadcast %31 : f32 to vector<8x128xf32>
    %33 = arith.maximumf %32, %30 : vector<8x128xf32>
    %34 = vector.broadcast %0 : f32 to vector<8x128xf32>
    %35 = arith.minimumf %34, %33 : vector<8x128xf32>
    %36 = arith.subf %30, %35 : vector<8x128xf32>
    %c0_25 = arith.constant 0 : index
    %c0_26 = arith.constant 0 : index
    %37 = vector.load %arg5[%c0_25, %c0_26] : memref<8x256xf32, #tpu.memory_space<vmem>>, vector<8x128xf32>
    tpu.vector_store %arg5[%c0_25, %c0_26], %36 {strides = array<i32>} : memref<8x256xf32, #tpu.memory_space<vmem>>, vector<8x128xf32>,
    %c2_i32_27 = arith.constant 2 : i32
    %c3 = arith.constant 3 : index
    %c0_28 = arith.constant 0 : index
    %c0_29 = arith.constant 0 : index
    %38 = vector.load %arg3[%c3, %c0_28, %c0_29] : memref<4x256x128xf32, #tpu.memory_space<vmem>>, vector<1x256x128xf32>
    %39 = vector.shape_cast %38 : vector<1x256x128xf32> to vector<256x128xf32>
    %c0_30 = arith.constant 0 : index
    %c0_31 = arith.constant 0 : index
    %40 = vector.load %arg5[%c0_30, %c0_31] : memref<8x256xf32, #tpu.memory_space<vmem>>, vector<8x256xf32>
    %cst_32 = arith.constant dense<0.000000e+00> : vector<8x128xf32>
    %41 = tpu.matmul %40, %39, %cst_32 {dimension_numbers = #tpu.dot_dimension_numbers<[1], [0], [0], [1], [0, 0, 1, 1], [], []>} : vector<8x256xf32>, vector<256x128xf32>, vector<8x128xf32> -> vector<8x128xf32>
    %cst_33 = arith.constant 0.000000e+00 : f32
    %42 = arith.subf %cst_33, %0 : f32
    %43 = vector.broadcast %42 : f32 to vector<8x128xf32>
    %44 = arith.maximumf %43, %41 : vector<8x128xf32>
    %45 = vector.broadcast %0 : f32 to vector<8x128xf32>
    %46 = arith.minimumf %45, %44 : vector<8x128xf32>
    %47 = arith.subf %41, %46 : vector<8x128xf32>
    %c0_34 = arith.constant 0 : index
    %c0_35 = arith.constant 0 : index
    %48 = vector.load %arg4[%c0_34, %c0_35] : memref<8x128xf32, #tpu.memory_space<vmem>>, vector<8x128xf32>
    tpu.vector_store %arg4[%c0_34, %c0_35], %47 {strides = array<i32>} : memref<8x128xf32, #tpu.memory_space<vmem>>, vector<8x128xf32>,
    return
  }
  func.func @transform_0(%arg0: i32, %arg1: memref<1xf32, #tpu.memory_space<smem>>) -> (i32, i32) {
    %c0_i32 = arith.constant 0 : i32
    %c0_i32_0 = arith.constant 0 : i32
    return %arg0, %c0_i32 : i32, i32
  }
  func.func @transform_1(%arg0: i32, %arg1: memref<1xf32, #tpu.memory_space<smem>>) -> (i32, i32, i32) {
    %c0_i32 = arith.constant 0 : i32
    %c0_i32_0 = arith.constant 0 : i32
    %c0_i32_1 = arith.constant 0 : i32
    %c0_i32_2 = arith.constant 0 : i32
    return %c0_i32, %c0_i32_0, %c0_i32_1 : i32, i32, i32
  }
  func.func @transform_2(%arg0: i32, %arg1: memref<1xf32, #tpu.memory_space<smem>>) -> (i32, i32) {
    %c0_i32 = arith.constant 0 : i32
    %c0_i32_0 = arith.constant 0 : i32
    return %arg0, %c0_i32 : i32, i32
  }
}

module attributes {stable_mosaic.version = 11 : i64} {
  func.func @_lista_kernel(%arg0: i32, %arg1: memref<1xf32, #tpu.memory_space<smem>>, %arg2: memref<8x128xf32, #tpu.memory_space<vmem>>, %arg3: memref<4x256x128xf32, #tpu.memory_space<vmem>>, %arg4: memref<8x128xf32, #tpu.memory_space<vmem>>, %arg5: memref<8x256xf32, #tpu.memory_space<vmem>>) attributes {dimension_semantics = [#tpu.dimension_semantics<parallel>], iteration_bounds = array<i64: 1>, scalar_prefetch = 1 : i64, scratch_operands = 1 : i64, tpu.core_type = #tpu.core_type<tc>, window_params = [{transform_indices = @transform_0, window_bounds = array<i64: 8, 128>}, {pipeline_mode = #tpu.pipeline_mode<synchronous>, transform_indices = @transform_1, window_bounds = array<i64: 4, 256, 128>}, {transform_indices = @transform_2, window_bounds = array<i64: 8, 128>}]} {
    %c0 = arith.constant 0 : index
    %0 = memref.load %arg1[%c0] : memref<1xf32, #tpu.memory_space<smem>>
    %c0_0 = arith.constant 0 : index
    %c0_1 = arith.constant 0 : index
    %1 = vector.load %arg2[%c0_0, %c0_1] : memref<8x128xf32, #tpu.memory_space<vmem>>, vector<8x128xf32>
    %c0_2 = arith.constant 0 : index
    %c128 = arith.constant 128 : index
    %2 = vector.load %arg5[%c0_2, %c128] : memref<8x256xf32, #tpu.memory_space<vmem>>, vector<8x128xf32>
    tpu.vector_store %arg5[%c0_2, %c128], %1 {strides = array<i32>} : memref<8x256xf32, #tpu.memory_space<vmem>>, vector<8x128xf32>,
    %c0_3 = arith.constant 0 : index
    %c128_4 = arith.constant 128 : index
    %c0_5 = arith.constant 0 : index
    %3 = vector.load %arg3[%c0_3, %c128_4, %c0_5] : memref<4x256x128xf32, #tpu.memory_space<vmem>>, vector<1x128x128xf32>
    %4 = vector.shape_cast %3 : vector<1x128x128xf32> to vector<128x128xf32>
    %c0_6 = arith.constant 0 : index
    %c0_7 = arith.constant 0 : index
    %5 = vector.load %arg2[%c0_6, %c0_7] : memref<8x128xf32, #tpu.memory_space<vmem>>, vector<8x128xf32>
    %cst = arith.constant dense<0.000000e+00> : vector<8x128xf32>
    %6 = tpu.matmul %5, %4, %cst {dimension_numbers = #tpu.dot_dimension_numbers<[1], [0], [0], [1], [0, 0, 1, 1], [], []>} : vector<8x128xf32>, vector<128x128xf32>, vector<8x128xf32> -> vector<8x128xf32>
    %cst_8 = arith.constant 0.000000e+00 : f32
    %7 = arith.subf %cst_8, %0 : f32
    %8 = vector.broadcast %7 : f32 to vector<8x128xf32>
    %9 = arith.maximumf %8, %6 : vector<8x128xf32>
    %10 = vector.broadcast %0 : f32 to vector<8x128xf32>
    %11 = arith.minimumf %10, %9 : vector<8x128xf32>
    %12 = arith.subf %6, %11 : vector<8x128xf32>
    %c0_9 = arith.constant 0 : index
    %c0_10 = arith.constant 0 : index
    %13 = vector.load %arg5[%c0_9, %c0_10] : memref<8x256xf32, #tpu.memory_space<vmem>>, vector<8x128xf32>
    tpu.vector_store %arg5[%c0_9, %c0_10], %12 {strides = array<i32>} : memref<8x256xf32, #tpu.memory_space<vmem>>, vector<8x128xf32>,
    %c1_i32 = arith.constant 1 : i32
    %14 = arith.index_cast %c1_i32 : i32 to index
    %c0_11 = arith.constant 0 : index
    %c0_12 = arith.constant 0 : index
    %15 = vector.load %arg3[%14, %c0_11, %c0_12] : memref<4x256x128xf32, #tpu.memory_space<vmem>>, vector<1x256x128xf32>
    %16 = vector.shape_cast %15 : vector<1x256x128xf32> to vector<256x128xf32>
    %c0_13 = arith.constant 0 : index
    %c0_14 = arith.constant 0 : index
    %17 = vector.load %arg5[%c0_13, %c0_14] : memref<8x256xf32, #tpu.memory_space<vmem>>, vector<8x256xf32>
    %cst_15 = arith.constant dense<0.000000e+00> : vector<8x128xf32>
    %18 = tpu.matmul %17, %16, %cst_15 {dimension_numbers = #tpu.dot_dimension_numbers<[1], [0], [0], [1], [0, 0, 1, 1], [], []>} : vector<8x256xf32>, vector<256x128xf32>, vector<8x128xf32> -> vector<8x128xf32>
    %cst_16 = arith.constant 0.000000e+00 : f32
    %19 = arith.subf %cst_16, %0 : f32
    %20 = vector.broadcast %19 : f32 to vector<8x128xf32>
    %21 = arith.maximumf %20, %18 : vector<8x128xf32>
    %22 = vector.broadcast %0 : f32 to vector<8x128xf32>
    %23 = arith.minimumf %22, %21 : vector<8x128xf32>
    %24 = arith.subf %18, %23 : vector<8x128xf32>
    %c0_17 = arith.constant 0 : index
    %c0_18 = arith.constant 0 : index
    %25 = vector.load %arg5[%c0_17, %c0_18] : memref<8x256xf32, #tpu.memory_space<vmem>>, vector<8x128xf32>
    tpu.vector_store %arg5[%c0_17, %c0_18], %24 {strides = array<i32>} : memref<8x256xf32, #tpu.memory_space<vmem>>, vector<8x128xf32>,
    %c2_i32 = arith.constant 2 : i32
    %26 = arith.index_cast %c2_i32 : i32 to index
    %c0_19 = arith.constant 0 : index
    %c0_20 = arith.constant 0 : index
    %27 = vector.load %arg3[%26, %c0_19, %c0_20] : memref<4x256x128xf32, #tpu.memory_space<vmem>>, vector<1x256x128xf32>
    %28 = vector.shape_cast %27 : vector<1x256x128xf32> to vector<256x128xf32>
    %c0_21 = arith.constant 0 : index
    %c0_22 = arith.constant 0 : index
    %29 = vector.load %arg5[%c0_21, %c0_22] : memref<8x256xf32, #tpu.memory_space<vmem>>, vector<8x256xf32>
    %cst_23 = arith.constant dense<0.000000e+00> : vector<8x128xf32>
    %30 = tpu.matmul %29, %28, %cst_23 {dimension_numbers = #tpu.dot_dimension_numbers<[1], [0], [0], [1], [0, 0, 1, 1], [], []>} : vector<8x256xf32>, vector<256x128xf32>, vector<8x128xf32> -> vector<8x128xf32>
    %cst_24 = arith.constant 0.000000e+00 : f32
    %31 = arith.subf %cst_24, %0 : f32
    %32 = vector.broadcast %31 : f32 to vector<8x128xf32>
    %33 = arith.maximumf %32, %30 : vector<8x128xf32>
    %34 = vector.broadcast %0 : f32 to vector<8x128xf32>
    %35 = arith.minimumf %34, %33 : vector<8x128xf32>
    %36 = arith.subf %30, %35 : vector<8x128xf32>
    %c0_25 = arith.constant 0 : index
    %c0_26 = arith.constant 0 : index
    %37 = vector.load %arg5[%c0_25, %c0_26] : memref<8x256xf32, #tpu.memory_space<vmem>>, vector<8x128xf32>
    tpu.vector_store %arg5[%c0_25, %c0_26], %36 {strides = array<i32>} : memref<8x256xf32, #tpu.memory_space<vmem>>, vector<8x128xf32>,
    %c2_i32_27 = arith.constant 2 : i32
    %c3 = arith.constant 3 : index
    %c0_28 = arith.constant 0 : index
    %c0_29 = arith.constant 0 : index
    %38 = vector.load %arg3[%c3, %c0_28, %c0_29] : memref<4x256x128xf32, #tpu.memory_space<vmem>>, vector<1x256x128xf32>
    %39 = vector.shape_cast %38 : vector<1x256x128xf32> to vector<256x128xf32>
    %c0_30 = arith.constant 0 : index
    %c0_31 = arith.constant 0 : index
    %40 = vector.load %arg5[%c0_30, %c0_31] : memref<8x256xf32, #tpu.memory_space<vmem>>, vector<8x256xf32>
    %cst_32 = arith.constant dense<0.000000e+00> : vector<8x128xf32>
    %41 = tpu.matmul %40, %39, %cst_32 {dimension_numbers = #tpu.dot_dimension_numbers<[1], [0], [0], [1], [0, 0, 1, 1], [], []>} : vector<8x256xf32>, vector<256x128xf32>, vector<8x128xf32> -> vector<8x128xf32>
    %cst_33 = arith.constant 0.000000e+00 : f32
    %42 = arith.subf %cst_33, %0 : f32
    %43 = vector.broadcast %42 : f32 to vector<8x128xf32>
    %44 = arith.maximumf %43, %41 : vector<8x128xf32>
    %45 = vector.broadcast %0 : f32 to vector<8x128xf32>
    %46 = arith.minimumf %45, %44 : vector<8x128xf32>
    %47 = arith.subf %41, %46 : vector<8x128xf32>
    %c0_34 = arith.constant 0 : index
    %c0_35 = arith.constant 0 : index
    %48 = vector.load %arg4[%c0_34, %c0_35] : memref<8x128xf32, #tpu.memory_space<vmem>>, vector<8x128xf32>
    tpu.vector_store %arg4[%c0_34, %c0_35], %47 {strides = array<i32>} : memref<8x128xf32, #tpu.memory_space<vmem>>, vector<8x128xf32>,
    return
  }
  func.func @transform_0(%arg0: i32, %arg1: memref<1xf32, #tpu.memory_space<smem>>) -> (i32, i32) {
    %c0_i32 = arith.constant 0 : i32
    %c0_i32_0 = arith.constant 0 : i32
    return %arg0, %c0_i32 : i32, i32
  }
  func.func @transform_1(%arg0: i32, %arg1: memref<1xf32, #tpu.memory_space<smem>>) -> (i32, i32, i32) {
    %c0_i32 = arith.constant 0 : i32
    %c0_i32_0 = arith.constant 0 : i32
    %c0_i32_1 = arith.constant 0 : i32
    %c0_i32_2 = arith.constant 0 : i32
    return %c0_i32, %c0_i32_0, %c0_i32_1 : i32, i32, i32
  }
  func.func @transform_2(%arg0: i32, %arg1: memref<1xf32, #tpu.memory_space<smem>>) -> (i32, i32) {
    %c0_i32 = arith.constant 0 : i32
    %c0_i32_0 = arith.constant 0 : i32
    return %arg0, %c0_i32 : i32, i32
  }
}

</mosaic_0001>

<bundles_post_ra>
// kernel: tpu_custom_call.1
= control target key start
LH: loop header
LB: loop body
LE: loop exit
PB: predicated region body
PF: predicated region fallthrough
CT: control target
= control target key end

     0   :  { %9 = vsyncpa [#allocation6], 0  ;;  %s787_s0 = inlined_call_operand.<no memory space> [shape: f32[1], index: 0, kind: input, shape index: {}]   ;;  %s788_s1 = inlined_call_operand.hbm [shape: f32[8,128], index: 1, kind: input, shape index: {}]   ;;  %s789_s2 = inlined_call_operand.hbm [shape: f32[4,256,128], index: 2, kind: input, shape index: {}]   ;;  %s790_s3 = inlined_call_operand.hbm [shape: f32[8,128], index: 3, kind: output, shape index: {}]  }
   0x1   :  { %10 = vsyncpa [#allocation9], 0 }
   0x2   :  { %11 = vsyncpa [#allocation7], 0  ;;  %s710_s12 = smov [#allocation5]   ;;  %s711_s14 = smov [#allocation8]  }
   0x3   :  { %s18_s13 = sshll.u32 %s710_s12, 4  ;;  %s27_s15 = sshll.u32 %s711_s14, 4  ;;  %s19_s13 = int_to_ptr.vmem [resolvable:$true] %s18_s13  ;;  %s28_s15 = int_to_ptr.vmem [resolvable:$true] %s27_s15 }
   0x4   :  { %s652_s16 = scalar_lea.vmem %s19_s13, 128  ;;  %p657_p1 = scmp.lt.s32.totalorder %s19_s13, %s19_s13 }
   0x5   :  { %p653_p0 = scmp.ne.s32.totalorder %s19_s13, %s652_s16  ;;  %p658_p2 = scmp.lt.s32.totalorder %s652_s16, %s652_s16 }
   0x7   :  { %p659_p3 = por %p658_p2, %p657_p1 }
   0x9   :  { %p660_p4 = pnand %p659_p3, %p653_p0 }
   0xb   :  { %663 = shalt.err (!%p660_p4)
}
   0xc   :  { %21 = dma.hbm_to_vmem [thread:$0]  %s788_s1, 128, %s19_s13, [#allocation6]  }
   0xd   :  { %s672_s19 = scalar_lea.vmem %s28_s15, 16384  ;;  %p677_p6 = scmp.lt.s32.totalorder %s28_s15, %s28_s15 }
   0xe   :  { %p673_p5 = scmp.ne.s32.totalorder %s28_s15, %s672_s19  ;;  %p678_p7 = scmp.lt.s32.totalorder %s672_s19, %s672_s19 }
  0x10   :  { %p679_p8 = por %p678_p7, %p677_p6 }
  0x12   :  { %p680_p9 = pnand %p679_p8, %p673_p5 }
  0x14   :  { %683 = shalt.err (!%p680_p9)
}
  0x15   :  { %s712_s20 = smov 128   ;;  %s713_s21 = smov 8  }
  0x16   :  { %33 = dma.hbm_to_vmem [thread:$0]  %s789_s2, 16384, %s28_s15, [#allocation9], %s712_s20, %s712_s20, %s713_s21  }
  0x17   :  { %704 = dma.done.wait [#allocation6], 128  }
  0x18   :  { %705 = vsyncadd [#allocation6], 4294967168 }
  0x19   :  { %706 = dma.done.wait [#allocation9], 16384  }
  0x1a   :  { %707 = vsyncadd [#allocation9], 4294950912  ;;  %v714_v0 = vmov 0.0   ;;  %vm715_vm0 = vmmov 0   ;;  %v58_v1 = vld [vmem:[#allocation8 + $0xf8] sm:$0xff]  ;;  %v57_v2 = vld [vmem:[#allocation8 + $0xf0] sm:$0xff] }
  0x1b   :  { %602 = vmatprep.subr.mxu0 %v714_v0  ;;  %634 = vmatprep.mubr.msk.f32.mxu0 %vm715_vm0, %v714_v0  ;;  %v56_v3 = vld [vmem:[#allocation8 + $0xe8] sm:$0xff]  ;;  %v55_v4 = vld [vmem:[#allocation8 + $0xe0] sm:$0xff]  ;;  %v54_v5 = vld [vmem:[#allocation8 + $0xd8] sm:$0xff]  ;;  %s130_s24 = ssub.f32 0.0, %s787_s0 }
  0x1c   :  { %603 = vmatpush3.msra.mxu0 %v58_v1  ;;  %v169_v6 = vld [vmem:[#allocation8 + $0x1f8] sm:$0xff]  ;;  %v168_v8 = vld [vmem:[#allocation8 + $0x1f0] sm:$0xff]  ;;  %v167_v10 = vld [vmem:[#allocation8 + $0x1e8] sm:$0xff] }
  0x1d   :  { %604 = vmatprep.subr.mxu0 %v714_v0  ;;  %497 = vmatprep.subr.mxu1 %v169_v6  ;;  %v153_v7 = vld [vmem:[#allocation8 + $0x178] sm:$0xff]  ;;  %v152_v9 = vld [vmem:[#allocation8 + $0x170] sm:$0xff]  ;;  %v151_v12 = vld [vmem:[#allocation8 + $0x168] sm:$0xff] }
  0x1e   :  { %605 = vmatpush3.msra.mxu0 %v57_v2  ;;  %498 = vmatpush3.msra.mxu1 %v153_v7  ;;  %v53_v11 = vld [vmem:[#allocation8 + $0xd0] sm:$0xff]  ;;  %v166_v13 = vld [vmem:[#allocation8 + $0x1e0] sm:$0xff]  ;;  %v52_v14 = vld [vmem:[#allocation8 + $0xc8] sm:$0xff]  ;;  %v768_v7 = vstv %s130_s24 }
  0x1f   :  { %606 = vmatprep.subr.mxu0 %v714_v0  ;;  %499 = vmatprep.subr.mxu1 %v168_v8  ;;  %v150_v15 = vld [vmem:[#allocation8 + $0x160] sm:$0xff]  ;;  %v165_v16 = vld [vmem:[#allocation8 + $0x1d8] sm:$0xff]  ;;  %v164_v19 = vld [vmem:[#allocation8 + $0x1d0] sm:$0xff] }
  0x20   :  { %607 = vmatpush3.msra.mxu0 %v56_v3  ;;  %500 = vmatpush3.msra.mxu1 %v152_v9  ;;  %v51_v17 = vld [vmem:[#allocation8 + $0xc0] sm:$0xff]  ;;  %v149_v18 = vld [vmem:[#allocation8 + $0x158] sm:$0xff]  ;;  %v148_v21 = vld [vmem:[#allocation8 + $0x150] sm:$0xff]  ;;  %v773_v9 = vstv %s787_s0  ;;  %s716_s0 = smov [#allocation10]  }
  0x21   :  { %608 = vmatprep.subr.mxu0 %v714_v0  ;;  %501 = vmatprep.subr.mxu1 %v167_v10  ;;  %v50_v20 = vld [vmem:[#allocation8 + $0xb8] sm:$0xff]  ;;  %v163_v22 = vld [vmem:[#allocation8 + $0x1c8] sm:$0xff]  ;;  %v49_v23 = vld [vmem:[#allocation8 + $0xb0] sm:$0xff]  ;;  %s470_s27 = sshll.u32 %s716_s0, 4  ;;  %s471_s27 = int_to_ptr.vmem [resolvable:$true] %s470_s27 }
  0x22   :  { %609 = vmatpush3.msra.mxu0 %v55_v4  ;;  %502 = vmatpush3.msra.mxu1 %v151_v12  ;;  %v147_v24 = vld [vmem:[#allocation8 + $0x148] sm:$0xff]  ;;  %v162_v25 = vld [vmem:[#allocation8 + $0x1c0] sm:$0xff]  ;;  %v161_v28 = vld [vmem:[#allocation8 + $0x1b8] sm:$0xff]  ;;  %s684_s28 = scalar_lea.vmem %s471_s27, 128  ;;  %p689_p11 = scmp.lt.s32.totalorder %s471_s27, %s471_s27 }
  0x23   :  { %610 = vmatprep.subr.mxu0 %v714_v0  ;;  %503 = vmatprep.subr.mxu1 %v166_v13  ;;  %v48_v26 = vld [vmem:[#allocation8 + $0xa8] sm:$0xff]  ;;  %v146_v27 = vld [vmem:[#allocation8 + $0x140] sm:$0xff]  ;;  %v145_v30 = vld [vmem:[#allocation8 + $0x138] sm:$0xff]  ;;  %p685_p10 = scmp.ne.s32.totalorder %s471_s27, %s684_s28  ;;  %p690_p12 = scmp.lt.s32.totalorder %s684_s28, %s684_s28 }
  0x24   :  { %611 = vmatpush3.msra.mxu0 %v54_v5  ;;  %504 = vmatpush3.msra.mxu1 %v150_v15  ;;  %v47_v29 = vld [vmem:[#allocation8 + $0xa0] sm:$0xff]  ;;  %v160_v31 = vld [vmem:[#allocation8 + $0x1b0] sm:$0xff]  ;;  %v46_v32 = vld [vmem:[#allocation8 + $0x98] sm:$0xff] }
  0x25   :  { %612 = vmatprep.subr.mxu0 %v714_v0  ;;  %505 = vmatprep.subr.mxu1 %v165_v16  ;;  %v144_v33 = vld [vmem:[#allocation8 + $0x130] sm:$0xff]  ;;  %v159_v34 = vld [vmem:[#allocation8 + $0x1a8] sm:$0xff]  ;;  %v158_v37 = vld [vmem:[#allocation8 + $0x1a0] sm:$0xff]  ;;  %p691_p13 = por %p690_p12, %p689_p11 }
  0x26   :  { %613 = vmatpush3.msra.mxu0 %v53_v11  ;;  %506 = vmatpush3.msra.mxu1 %v149_v18  ;;  %v45_v35 = vld [vmem:[#allocation8 + $0x90] sm:$0xff]  ;;  %v143_v36 = vld [vmem:[#allocation8 + $0x128] sm:$0xff]  ;;  %v142_v39 = vld [vmem:[#allocation8 + $0x120] sm:$0xff] }
  0x27   :  { %614 = vmatprep.subr.mxu0 %v714_v0  ;;  %507 = vmatprep.subr.mxu1 %v164_v19  ;;  %v44_v38 = vld [vmem:[#allocation8 + $0x88] sm:$0xff]  ;;  %v157_v40 = vld [vmem:[#allocation8 + $0x198] sm:$0xff]  ;;  %v43_v41 = vld [vmem:[#allocation8 + $0x80] sm:$0xff]  ;;  %p692_p0 = pnand %p691_p13, %p685_p10 }
  0x28   :  { %615 = vmatpush3.msra.mxu0 %v52_v14  ;;  %508 = vmatpush3.msra.mxu1 %v148_v21  ;;  %v759_v42 = vld [vmem:[#allocation5] sm:$0xff]  ;;  %v156_v44 = vld [vmem:[#allocation8 + $0x190] sm:$0xff]  ;;  %v155_v46 = vld [vmem:[#allocation8 + $0x188] sm:$0xff] }
  0x29   :  { %616 = vmatprep.subr.mxu0 %v714_v0  ;;  %509 = vmatprep.subr.mxu1 %v163_v22  ;;  %v141_v43 = vld [vmem:[#allocation8 + $0x118] sm:$0xff]  ;;  %v140_v45 = vld [vmem:[#allocation8 + $0x110] sm:$0xff]  ;;  %v139_v47 = vld [vmem:[#allocation8 + $0x108] sm:$0xff] }
  0x2a   :  { %617 = vmatpush3.msra.mxu0 %v51_v17  ;;  %510 = vmatpush3.msra.mxu1 %v147_v24  ;;  %v154_v48 = vld [vmem:[#allocation8 + $0x180] sm:$0xff]  ;;  %v278_v50 = vld [vmem:[#allocation8 + $0x2f8] sm:$0xff]  ;;  %v277_v52 = vld [vmem:[#allocation8 + $0x2f0] sm:$0xff] }
  0x2b   :  { %618 = vmatprep.subr.mxu0 %v714_v0  ;;  %511 = vmatprep.subr.mxu1 %v162_v25  ;;  %v138_v49 = vld [vmem:[#allocation8 + $0x100] sm:$0xff]  ;;  %v262_v51 = vld [vmem:[#allocation8 + $0x278] sm:$0xff]  ;;  %v261_v53 = vld [vmem:[#allocation8 + $0x270] sm:$0xff] }
  0x2c   :  { %619 = vmatpush3.msra.mxu0 %v50_v20  ;;  %512 = vmatpush3.msra.mxu1 %v146_v27  ;;  %v276_v54 = vld [vmem:[#allocation8 + $0x2e8] sm:$0xff]  ;;  %v275_v56 = vld [vmem:[#allocation8 + $0x2e0] sm:$0xff]  ;;  %v274_v58 = vld [vmem:[#allocation8 + $0x2d8] sm:$0xff] }
  0x2d   :  { %620 = vmatprep.subr.mxu0 %v714_v0  ;;  %513 = vmatprep.subr.mxu1 %v161_v28  ;;  %v260_v55 = vld [vmem:[#allocation8 + $0x268] sm:$0xff]  ;;  %v259_v57 = vld [vmem:[#allocation8 + $0x260] sm:$0xff]  ;;  %v258_v59 = vld [vmem:[#allocation8 + $0x258] sm:$0xff] }
  0x2e   :  { %621 = vmatpush3.msra.mxu0 %v49_v23  ;;  %514 = vmatpush3.msra.mxu1 %v145_v30  ;;  %v273_v60 = vld [vmem:[#allocation8 + $0x2d0] sm:$0xff]  ;;  %v272_v62 = vld [vmem:[#allocation8 + $0x2c8] sm:$0xff]  ;;  %v255_v1 = vld [vmem:[#allocation8 + $0x240] sm:$0xff] }
  0x2f   :  { %622 = vmatprep.subr.mxu0 %v714_v0  ;;  %515 = vmatprep.subr.mxu1 %v160_v31  ;;  %v257_v61 = vld [vmem:[#allocation8 + $0x250] sm:$0xff]  ;;  %v256_v63 = vld [vmem:[#allocation8 + $0x248] sm:$0xff]  ;;  %v270_v2 = vld [vmem:[#allocation8 + $0x2b8] sm:$0xff] }
  0x30   :  { %623 = vmatpush3.msra.mxu0 %v48_v26  ;;  %516 = vmatpush3.msra.mxu1 %v144_v33  ;;  %v254_v3 = vld [vmem:[#allocation8 + $0x238] sm:$0xff]  ;;  %v269_v4 = vld [vmem:[#allocation8 + $0x2b0] sm:$0xff]  ;;  %v268_v6 = vld [vmem:[#allocation8 + $0x2a8] sm:$0xff] }
  0x31   :  { %624 = vmatprep.subr.mxu0 %v714_v0  ;;  %517 = vmatprep.subr.mxu1 %v159_v34  ;;  %v253_v5 = vld [vmem:[#allocation8 + $0x230] sm:$0xff]  ;;  %v252_v14 = vld [vmem:[#allocation8 + $0x228] sm:$0xff]  ;;  %v267_v15 = vld [vmem:[#allocation8 + $0x2a0] sm:$0xff] }
  0x32   :  { %625 = vmatpush3.msra.mxu0 %v47_v29  ;;  %518 = vmatpush3.msra.mxu1 %v143_v36  ;;  %v251_v16 = vld [vmem:[#allocation8 + $0x220] sm:$0xff]  ;;  %v266_v17 = vld [vmem:[#allocation8 + $0x298] sm:$0xff]  ;;  %v265_v19 = vld [vmem:[#allocation8 + $0x290] sm:$0xff] }
  0x33   :  { %626 = vmatprep.subr.mxu0 %v714_v0  ;;  %519 = vmatprep.subr.mxu1 %v158_v37  ;;  %v250_v18 = vld [vmem:[#allocation8 + $0x218] sm:$0xff]  ;;  %v249_v20 = vld [vmem:[#allocation8 + $0x210] sm:$0xff]  ;;  %v264_v21 = vld [vmem:[#allocation8 + $0x288] sm:$0xff] }
  0x34   :  { %627 = vmatpush3.msra.mxu0 %v46_v32  ;;  %520 = vmatpush3.msra.mxu1 %v142_v39  ;;  %v248_v22 = vld [vmem:[#allocation8 + $0x208] sm:$0xff]  ;;  %v263_v23 = vld [vmem:[#allocation8 + $0x280] sm:$0xff]  ;;  %v387_v25 = vld [vmem:[#allocation8 + $0x3f8] sm:$0xff] }
  0x35   :  { %628 = vmatprep.subr.mxu0 %v714_v0  ;;  %521 = vmatprep.subr.mxu1 %v157_v40  ;;  %v247_v24 = vld [vmem:[#allocation8 + $0x200] sm:$0xff]  ;;  %v371_v26 = vld [vmem:[#allocation8 + $0x378] sm:$0xff]  ;;  %v386_v27 = vld [vmem:[#allocation8 + $0x3f0] sm:$0xff] }
  0x36   :  { %629 = vmatpush3.msra.mxu0 %v45_v35  ;;  %236 = vmatprep.mubr.f32.mxu1 %v759_v42  ;;  %v370_v28 = vld [vmem:[#allocation8 + $0x370] sm:$0xff]  ;;  %v385_v29 = vld [vmem:[#allocation8 + $0x3e8] sm:$0xff]  ;;  %v384_v31 = vld [vmem:[#allocation8 + $0x3e0] sm:$0xff] }
  0x37   :  { %630 = vmatprep.subr.mxu0 %v714_v0  ;;  %522 = vmatpush3.msra.mxu1 %v141_v43  ;;  %v369_v30 = vld [vmem:[#allocation8 + $0x368] sm:$0xff]  ;;  %v368_v32 = vld [vmem:[#allocation8 + $0x360] sm:$0xff]  ;;  %v383_v33 = vld [vmem:[#allocation8 + $0x3d8] sm:$0xff] }
  0x38   :  { %631 = vmatpush3.msra.mxu0 %v44_v38  ;;  %523 = vmatprep.subr.mxu1 %v156_v44  ;;  %v367_v34 = vld [vmem:[#allocation8 + $0x358] sm:$0xff]  ;;  %v382_v35 = vld [vmem:[#allocation8 + $0x3d0] sm:$0xff]  ;;  %v381_v37 = vld [vmem:[#allocation8 + $0x3c8] sm:$0xff] }
  0x39   :  { %632 = vmatprep.subr.mxu0 %v714_v0  ;;  %524 = vmatpush3.msra.mxu1 %v140_v45  ;;  %v271_v0 = vld [vmem:[#allocation8 + $0x2c0] sm:$0xff]  ;;  %v366_v36 = vld [vmem:[#allocation8 + $0x350] sm:$0xff]  ;;  %v365_v38 = vld [vmem:[#allocation8 + $0x348] sm:$0xff] }
  0x3a   :  { %633 = vmatpush3.msra.mxu0 %v43_v41  ;;  %525 = vmatprep.subr.mxu1 %v155_v46  ;;  %v380_v39 = vld [vmem:[#allocation8 + $0x3c0] sm:$0xff]  ;;  %v379_v41 = vld [vmem:[#allocation8 + $0x3b8] sm:$0xff]  ;;  %v378_v43 = vld [vmem:[#allocation8 + $0x3b0] sm:$0xff] }
  0x3b   :  { %635 = vmatmul.mubr.f32.vlgmr.msra.gmra.mxu0 %v759_v42  ;;  %526 = vmatpush3.msra.mxu1 %v139_v47  ;;  %v364_v40 = vld [vmem:[#allocation8 + $0x340] sm:$0xff]  ;;  %v362_v44 = vld [vmem:[#allocation8 + $0x330] sm:$0xff]  ;;  %v377_v45 = vld [vmem:[#allocation8 + $0x3a8] sm:$0xff] }
  0x3c   :  { %345 = vmatprep.mubr.f32.mxu0 %v759_v42  ;;  %527 = vmatprep.subr.mxu1 %v154_v48 }
  0x3d   :  { %528 = vmatpush3.msra.mxu1 %v138_v49  ;;  %532 = vmatprep.subr.mxu0 %v278_v50 }
  0x3e   :  { %533 = vmatpush3.msra.mxu0 %v262_v51  ;;  %567 = vmatprep.subr.mxu1 %v387_v25 }
  0x3f   :  { %534 = vmatprep.subr.mxu0 %v277_v52  ;;  %v361_v52 = vld [vmem:[#allocation8 + $0x328] sm:$0xff] }
  0x40   :  { %535 = vmatpush3.msra.mxu0 %v261_v53  ;;  %v376_v53 = vld [vmem:[#allocation8 + $0x3a0] sm:$0xff] }
  0x41   :  { %536 = vmatprep.subr.mxu0 %v276_v54  ;;  %v360_v54 = vld [vmem:[#allocation8 + $0x320] sm:$0xff] }
  0x42   :  { %537 = vmatpush3.msra.mxu0 %v260_v55  ;;  %v375_v55 = vld [vmem:[#allocation8 + $0x398] sm:$0xff] }
  0x43   :  { %538 = vmatprep.subr.mxu0 %v275_v56  ;;  %v359_v56 = vld [vmem:[#allocation8 + $0x318] sm:$0xff] }
  0x44   :  { %539 = vmatpush3.msra.mxu0 %v259_v57  ;;  %v374_v57 = vld [vmem:[#allocation8 + $0x390] sm:$0xff] }
  0x45   :  { %540 = vmatprep.subr.mxu0 %v274_v58  ;;  %v358_v58 = vld [vmem:[#allocation8 + $0x310] sm:$0xff] }
  0x46   :  { %541 = vmatpush3.msra.mxu0 %v258_v59  ;;  %v373_v59 = vld [vmem:[#allocation8 + $0x388] sm:$0xff] }
  0x47   :  { %542 = vmatprep.subr.mxu0 %v273_v60  ;;  %v357_v60 = vld [vmem:[#allocation8 + $0x308] sm:$0xff] }
  0x48   :  { %543 = vmatpush3.msra.mxu0 %v257_v61  ;;  %v372_v61 = vld [vmem:[#allocation8 + $0x380] sm:$0xff] }
  0x49   :  { %544 = vmatprep.subr.mxu0 %v272_v62  ;;  %v356_v62 = vld [vmem:[#allocation8 + $0x300] sm:$0xff] }
  0x4a   :  { %545 = vmatpush3.msra.mxu0 %v256_v63 }
  0x4b   :  { %546 = vmatprep.subr.mxu0 %v271_v0 }
  0x4c   :  { %547 = vmatpush3.msra.mxu0 %v255_v1 }
  0x4d   :  { %548 = vmatprep.subr.mxu0 %v270_v2 }
  0x4e   :  { %549 = vmatpush3.msra.mxu0 %v254_v3 }
  0x4f   :  { %550 = vmatprep.subr.mxu0 %v269_v4 }
  0x50   :  { %551 = vmatpush3.msra.mxu0 %v253_v5 }
  0x51   :  { %552 = vmatprep.subr.mxu0 %v268_v6 }
  0x52   :  { %553 = vmatpush3.msra.mxu0 %v252_v14 }
  0x53   :  { %554 = vmatprep.subr.mxu0 %v267_v15 }
  0x54   :  { %555 = vmatpush3.msra.mxu0 %v251_v16 }
  0x55   :  { %556 = vmatprep.subr.mxu0 %v266_v17 }
  0x56   :  { %557 = vmatpush3.msra.mxu0 %v250_v18 }
  0x57   :  { %558 = vmatprep.subr.mxu0 %v265_v19 }
  0x58   :  { %559 = vmatpush3.msra.mxu0 %v249_v20 }
  0x59   :  { %560 = vmatprep.subr.mxu0 %v264_v21 }
  0x5a   :  { %561 = vmatpush3.msra.mxu0 %v248_v22 }
  0x5b   :  { %562 = vmatprep.subr.mxu0 %v263_v23 }
  0x5c   :  { %563 = vmatpush3.msra.mxu0 %v247_v24 }
  0xfb   :  { %v126_v8 = vpop.f32.mrf.mxu0 }
  0xfc   :  { %v132_v10 = vmax.f32 %v768_v7, %v126_v8 }
  0xfd   :  { %v636_v11 = vpop.f32.mrf.mxu0 }
  0xfe   :  { %v134_v12 = vmin.f32 %v773_v9, %v132_v10 }
 0x100   :  { %v135_v13 = vsub.f32 %v126_v8, %v134_v12 }
 0x102   :  { %237 = vmatmul.mubr.f32.vlgmr.msra.gmra.mxu1 %v135_v13 }
 0x103   :  { %454 = vmatprep.mubr.f32.mxu1 %v759_v42  ;;  %568 = vmatpush3.msra.mxu1 %v371_v26  ;;  %v363_v42 = vld [vmem:[#allocation8 + $0x338] sm:$0xff] }
 0x104   :  { %569 = vmatprep.subr.mxu1 %v386_v27 }
 0x105   :  { %570 = vmatpush3.msra.mxu1 %v370_v28 }
 0x106   :  { %571 = vmatprep.subr.mxu1 %v385_v29 }
 0x107   :  { %572 = vmatpush3.msra.mxu1 %v369_v30 }
 0x108   :  { %573 = vmatprep.subr.mxu1 %v384_v31 }
 0x109   :  { %574 = vmatpush3.msra.mxu1 %v368_v32 }
 0x10a   :  { %575 = vmatprep.subr.mxu1 %v383_v33 }
 0x10b   :  { %576 = vmatpush3.msra.mxu1 %v367_v34 }
 0x10c   :  { %577 = vmatprep.subr.mxu1 %v382_v35 }
 0x10d   :  { %578 = vmatpush3.msra.mxu1 %v366_v36 }
 0x10e   :  { %579 = vmatprep.subr.mxu1 %v381_v37 }
 0x10f   :  { %580 = vmatpush3.msra.mxu1 %v365_v38 }
 0x110   :  { %581 = vmatprep.subr.mxu1 %v380_v39 }
 0x111   :  { %582 = vmatpush3.msra.mxu1 %v364_v40 }
 0x112   :  { %583 = vmatprep.subr.mxu1 %v379_v41 }
 0x113   :  { %584 = vmatpush3.msra.mxu1 %v363_v42 }
 0x114   :  { %585 = vmatprep.subr.mxu1 %v378_v43 }
 0x115   :  { %586 = vmatpush3.msra.mxu1 %v362_v44 }
 0x116   :  { %587 = vmatprep.subr.mxu1 %v377_v45 }
 0x117   :  { %588 = vmatpush3.msra.mxu1 %v361_v52 }
 0x118   :  { %589 = vmatprep.subr.mxu1 %v376_v53 }
 0x119   :  { %590 = vmatpush3.msra.mxu1 %v360_v54 }
 0x11a   :  { %591 = vmatprep.subr.mxu1 %v375_v55 }
 0x11b   :  { %592 = vmatpush3.msra.mxu1 %v359_v56 }
 0x11c   :  { %593 = vmatprep.subr.mxu1 %v374_v57 }
 0x11d   :  { %594 = vmatpush3.msra.mxu1 %v358_v58 }
 0x11e   :  { %595 = vmatprep.subr.mxu1 %v373_v59 }
 0x11f   :  { %596 = vmatpush3.msra.mxu1 %v357_v60 }
 0x120   :  { %597 = vmatprep.subr.mxu1 %v372_v61 }
 0x121   :  { %598 = vmatpush3.msra.mxu1 %v356_v62 }
 0x1c2   :  { %v529_v46 = vpop.f32.mrf.mxu1 }
 0x1c4   :  { %v530_v47 = vpop.f32.mrf.mxu1 }
 0x1c5   :  { %v531_v48 = vadd.f32 %v530_v47, %v529_v46 }
 0x1c7   :  { %v242_v49 = vmax.f32 %v768_v7, %v531_v48 }
 0x1c9   :  { %v243_v50 = vmin.f32 %v773_v9, %v242_v49 }
 0x1cb   :  { %v244_v51 = vsub.f32 %v531_v48, %v243_v50 }
 0x1cd   :  { %346 = vmatmul.mubr.f32.vlgmr.msra.gmra.mxu0 %v244_v51 }
 0x28d   :  { %v564_v63 = vpop.f32.mrf.mxu0 }
 0x28f   :  { %v565_v0 = vpop.f32.mrf.mxu0 }
 0x290   :  { %v566_v1 = vadd.f32 %v565_v0, %v564_v63 }
 0x292   :  { %v351_v2 = vmax.f32 %v768_v7, %v566_v1 }
 0x294   :  { %v352_v3 = vmin.f32 %v773_v9, %v351_v2 }
 0x296   :  { %v353_v4 = vsub.f32 %v566_v1, %v352_v3 }
 0x298   :  { %455 = vmatmul.mubr.f32.vlgmr.msra.gmra.mxu1 %v353_v4 }
 0x358   :  { %v599_v5 = vpop.f32.mrf.mxu1 }
 0x35a   :  { %v600_v6 = vpop.f32.mrf.mxu1 }
 0x35b   :  { %v601_v8 = vadd.f32 %v600_v6, %v599_v5 }
 0x35d   :  { %v460_v10 = vmax.f32 %v768_v7, %v601_v8 }
 0x35f   :  { %v461_v11 = vmin.f32 %v773_v9, %v460_v10 }
 0x361   :  { %v462_v12 = vsub.f32 %v601_v8, %v461_v11 }
 0x363   :  { %463 = vst [vmem:[#allocation10] sm:$0xff] %v462_v12 }
 0x364   :  { %695 = shalt.err (!%p692_p0)
}
 0x365   :  { %473 = dma.vmem_to_hbm [thread:$0]  %s471_s27, 128, %s790_s3, [#allocation7]  }
 0x366   :  { %708 = dma.done.wait [#allocation7], 128  }
 0x367   :  { %709 = vsyncadd [#allocation7], 4294967168 }
 0x368   :  { %477 = vsyncpa [#allocation6], 1 }
 0x369   :  { %478 = vsyncpa [#allocation9], 1 }
 0x36a   :  { %479 = vsyncpa [#allocation7], 1 }

// kernel: tpu_custom_call.1
= control target key start
LH: loop header
LB: loop body
LE: loop exit
PB: predicated region body
PF: predicated region fallthrough
CT: control target
= control target key end

     0   :  { %9 = vsyncpa [#allocation6], 0  ;;  %s787_s0 = inlined_call_operand.<no memory space> [shape: f32[1], index: 0, kind: input, shape index: {}]   ;;  %s788_s1 = inlined_call_operand.hbm [shape: f32[8,128], index: 1, kind: input, shape index: {}]   ;;  %s789_s2 = inlined_call_operand.hbm [shape: f32[4,256,128], index: 2, kind: input, shape index: {}]   ;;  %s790_s3 = inlined_call_operand.hbm [shape: f32[8,128], index: 3, kind: output, shape index: {}]  }
   0x1   :  { %10 = vsyncpa [#allocation9], 0 }
   0x2   :  { %11 = vsyncpa [#allocation7], 0  ;;  %s710_s12 = smov [#allocation5]   ;;  %s711_s14 = smov [#allocation8]  }
   0x3   :  { %s18_s13 = sshll.u32 %s710_s12, 4  ;;  %s27_s15 = sshll.u32 %s711_s14, 4  ;;  %s19_s13 = int_to_ptr.vmem [resolvable:$true] %s18_s13  ;;  %s28_s15 = int_to_ptr.vmem [resolvable:$true] %s27_s15 }
   0x4   :  { %s652_s16 = scalar_lea.vmem %s19_s13, 128  ;;  %p657_p1 = scmp.lt.s32.totalorder %s19_s13, %s19_s13 }
   0x5   :  { %p653_p0 = scmp.ne.s32.totalorder %s19_s13, %s652_s16  ;;  %p658_p2 = scmp.lt.s32.totalorder %s652_s16, %s652_s16 }
   0x7   :  { %p659_p3 = por %p658_p2, %p657_p1 }
   0x9   :  { %p660_p4 = pnand %p659_p3, %p653_p0 }
   0xb   :  { %663 = shalt.err (!%p660_p4)
}
   0xc   :  { %21 = dma.hbm_to_vmem [thread:$0]  %s788_s1, 128, %s19_s13, [#allocation6]  }
   0xd   :  { %s672_s19 = scalar_lea.vmem %s28_s15, 16384  ;;  %p677_p6 = scmp.lt.s32.totalorder %s28_s15, %s28_s15 }
   0xe   :  { %p673_p5 = scmp.ne.s32.totalorder %s28_s15, %s672_s19  ;;  %p678_p7 = scmp.lt.s32.totalorder %s672_s19, %s672_s19 }
  0x10   :  { %p679_p8 = por %p678_p7, %p677_p6 }
  0x12   :  { %p680_p9 = pnand %p679_p8, %p673_p5 }
  0x14   :  { %683 = shalt.err (!%p680_p9)
}
  0x15   :  { %s712_s20 = smov 128   ;;  %s713_s21 = smov 8  }
  0x16   :  { %33 = dma.hbm_to_vmem [thread:$0]  %s789_s2, 16384, %s28_s15, [#allocation9], %s712_s20, %s712_s20, %s713_s21  }
  0x17   :  { %704 = dma.done.wait [#allocation6], 128  }
  0x18   :  { %705 = vsyncadd [#allocation6], 4294967168 }
  0x19   :  { %706 = dma.done.wait [#allocation9], 16384  }
  0x1a   :  { %707 = vsyncadd [#allocation9], 4294950912  ;;  %v714_v0 = vmov 0.0   ;;  %vm715_vm0 = vmmov 0   ;;  %v58_v1 = vld [vmem:[#allocation8 + $0xf8] sm:$0xff]  ;;  %v57_v2 = vld [vmem:[#allocation8 + $0xf0] sm:$0xff] }
  0x1b   :  { %602 = vmatprep.subr.mxu0 %v714_v0  ;;  %634 = vmatprep.mubr.msk.f32.mxu0 %vm715_vm0, %v714_v0  ;;  %v56_v3 = vld [vmem:[#allocation8 + $0xe8] sm:$0xff]  ;;  %v55_v4 = vld [vmem:[#allocation8 + $0xe0] sm:$0xff]  ;;  %v54_v5 = vld [vmem:[#allocation8 + $0xd8] sm:$0xff]  ;;  %s130_s24 = ssub.f32 0.0, %s787_s0 }
  0x1c   :  { %603 = vmatpush3.msra.mxu0 %v58_v1  ;;  %v169_v6 = vld [vmem:[#allocation8 + $0x1f8] sm:$0xff]  ;;  %v168_v8 = vld [vmem:[#allocation8 + $0x1f0] sm:$0xff]  ;;  %v167_v10 = vld [vmem:[#allocation8 + $0x1e8] sm:$0xff] }
  0x1d   :  { %604 = vmatprep.subr.mxu0 %v714_v0  ;;  %497 = vmatprep.subr.mxu1 %v169_v6  ;;  %v153_v7 = vld [vmem:[#allocation8 + $0x178] sm:$0xff]  ;;  %v152_v9 = vld [vmem:[#allocation8 + $0x170] sm:$0xff]  ;;  %v151_v12 = vld [vmem:[#allocation8 + $0x168] sm:$0xff] }
  0x1e   :  { %605 = vmatpush3.msra.mxu0 %v57_v2  ;;  %498 = vmatpush3.msra.mxu1 %v153_v7  ;;  %v53_v11 = vld [vmem:[#allocation8 + $0xd0] sm:$0xff]  ;;  %v166_v13 = vld [vmem:[#allocation8 + $0x1e0] sm:$0xff]  ;;  %v52_v14 = vld [vmem:[#allocation8 + $0xc8] sm:$0xff]  ;;  %v768_v7 = vstv %s130_s24 }
  0x1f   :  { %606 = vmatprep.subr.mxu0 %v714_v0  ;;  %499 = vmatprep.subr.mxu1 %v168_v8  ;;  %v150_v15 = vld [vmem:[#allocation8 + $0x160] sm:$0xff]  ;;  %v165_v16 = vld [vmem:[#allocation8 + $0x1d8] sm:$0xff]  ;;  %v164_v19 = vld [vmem:[#allocation8 + $0x1d0] sm:$0xff] }
  0x20   :  { %607 = vmatpush3.msra.mxu0 %v56_v3  ;;  %500 = vmatpush3.msra.mxu1 %v152_v9  ;;  %v51_v17 = vld [vmem:[#allocation8 + $0xc0] sm:$0xff]  ;;  %v149_v18 = vld [vmem:[#allocation8 + $0x158] sm:$0xff]  ;;  %v148_v21 = vld [vmem:[#allocation8 + $0x150] sm:$0xff]  ;;  %v773_v9 = vstv %s787_s0  ;;  %s716_s0 = smov [#allocation10]  }
  0x21   :  { %608 = vmatprep.subr.mxu0 %v714_v0  ;;  %501 = vmatprep.subr.mxu1 %v167_v10  ;;  %v50_v20 = vld [vmem:[#allocation8 + $0xb8] sm:$0xff]  ;;  %v163_v22 = vld [vmem:[#allocation8 + $0x1c8] sm:$0xff]  ;;  %v49_v23 = vld [vmem:[#allocation8 + $0xb0] sm:$0xff]  ;;  %s470_s27 = sshll.u32 %s716_s0, 4  ;;  %s471_s27 = int_to_ptr.vmem [resolvable:$true] %s470_s27 }
  0x22   :  { %609 = vmatpush3.msra.mxu0 %v55_v4  ;;  %502 = vmatpush3.msra.mxu1 %v151_v12  ;;  %v147_v24 = vld [vmem:[#allocation8 + $0x148] sm:$0xff]  ;;  %v162_v25 = vld [vmem:[#allocation8 + $0x1c0] sm:$0xff]  ;;  %v161_v28 = vld [vmem:[#allocation8 + $0x1b8] sm:$0xff]  ;;  %s684_s28 = scalar_lea.vmem %s471_s27, 128  ;;  %p689_p11 = scmp.lt.s32.totalorder %s471_s27, %s471_s27 }
  0x23   :  { %610 = vmatprep.subr.mxu0 %v714_v0  ;;  %503 = vmatprep.subr.mxu1 %v166_v13  ;;  %v48_v26 = vld [vmem:[#allocation8 + $0xa8] sm:$0xff]  ;;  %v146_v27 = vld [vmem:[#allocation8 + $0x140] sm:$0xff]  ;;  %v145_v30 = vld [vmem:[#allocation8 + $0x138] sm:$0xff]  ;;  %p685_p10 = scmp.ne.s32.totalorder %s471_s27, %s684_s28  ;;  %p690_p12 = scmp.lt.s32.totalorder %s684_s28, %s684_s28 }
  0x24   :  { %611 = vmatpush3.msra.mxu0 %v54_v5  ;;  %504 = vmatpush3.msra.mxu1 %v150_v15  ;;  %v47_v29 = vld [vmem:[#allocation8 + $0xa0] sm:$0xff]  ;;  %v160_v31 = vld [vmem:[#allocation8 + $0x1b0] sm:$0xff]  ;;  %v46_v32 = vld [vmem:[#allocation8 + $0x98] sm:$0xff] }
  0x25   :  { %612 = vmatprep.subr.mxu0 %v714_v0  ;;  %505 = vmatprep.subr.mxu1 %v165_v16  ;;  %v144_v33 = vld [vmem:[#allocation8 + $0x130] sm:$0xff]  ;;  %v159_v34 = vld [vmem:[#allocation8 + $0x1a8] sm:$0xff]  ;;  %v158_v37 = vld [vmem:[#allocation8 + $0x1a0] sm:$0xff]  ;;  %p691_p13 = por %p690_p12, %p689_p11 }
  0x26   :  { %613 = vmatpush3.msra.mxu0 %v53_v11  ;;  %506 = vmatpush3.msra.mxu1 %v149_v18  ;;  %v45_v35 = vld [vmem:[#allocation8 + $0x90] sm:$0xff]  ;;  %v143_v36 = vld [vmem:[#allocation8 + $0x128] sm:$0xff]  ;;  %v142_v39 = vld [vmem:[#allocation8 + $0x120] sm:$0xff] }
  0x27   :  { %614 = vmatprep.subr.mxu0 %v714_v0  ;;  %507 = vmatprep.subr.mxu1 %v164_v19  ;;  %v44_v38 = vld [vmem:[#allocation8 + $0x88] sm:$0xff]  ;;  %v157_v40 = vld [vmem:[#allocation8 + $0x198] sm:$0xff]  ;;  %v43_v41 = vld [vmem:[#allocation8 + $0x80] sm:$0xff]  ;;  %p692_p0 = pnand %p691_p13, %p685_p10 }
  0x28   :  { %615 = vmatpush3.msra.mxu0 %v52_v14  ;;  %508 = vmatpush3.msra.mxu1 %v148_v21  ;;  %v759_v42 = vld [vmem:[#allocation5] sm:$0xff]  ;;  %v156_v44 = vld [vmem:[#allocation8 + $0x190] sm:$0xff]  ;;  %v155_v46 = vld [vmem:[#allocation8 + $0x188] sm:$0xff] }
  0x29   :  { %616 = vmatprep.subr.mxu0 %v714_v0  ;;  %509 = vmatprep.subr.mxu1 %v163_v22  ;;  %v141_v43 = vld [vmem:[#allocation8 + $0x118] sm:$0xff]  ;;  %v140_v45 = vld [vmem:[#allocation8 + $0x110] sm:$0xff]  ;;  %v139_v47 = vld [vmem:[#allocation8 + $0x108] sm:$0xff] }
  0x2a   :  { %617 = vmatpush3.msra.mxu0 %v51_v17  ;;  %510 = vmatpush3.msra.mxu1 %v147_v24  ;;  %v154_v48 = vld [vmem:[#allocation8 + $0x180] sm:$0xff]  ;;  %v278_v50 = vld [vmem:[#allocation8 + $0x2f8] sm:$0xff]  ;;  %v277_v52 = vld [vmem:[#allocation8 + $0x2f0] sm:$0xff] }
  0x2b   :  { %618 = vmatprep.subr.mxu0 %v714_v0  ;;  %511 = vmatprep.subr.mxu1 %v162_v25  ;;  %v138_v49 = vld [vmem:[#allocation8 + $0x100] sm:$0xff]  ;;  %v262_v51 = vld [vmem:[#allocation8 + $0x278] sm:$0xff]  ;;  %v261_v53 = vld [vmem:[#allocation8 + $0x270] sm:$0xff] }
  0x2c   :  { %619 = vmatpush3.msra.mxu0 %v50_v20  ;;  %512 = vmatpush3.msra.mxu1 %v146_v27  ;;  %v276_v54 = vld [vmem:[#allocation8 + $0x2e8] sm:$0xff]  ;;  %v275_v56 = vld [vmem:[#allocation8 + $0x2e0] sm:$0xff]  ;;  %v274_v58 = vld [vmem:[#allocation8 + $0x2d8] sm:$0xff] }
  0x2d   :  { %620 = vmatprep.subr.mxu0 %v714_v0  ;;  %513 = vmatprep.subr.mxu1 %v161_v28  ;;  %v260_v55 = vld [vmem:[#allocation8 + $0x268] sm:$0xff]  ;;  %v259_v57 = vld [vmem:[#allocation8 + $0x260] sm:$0xff]  ;;  %v258_v59 = vld [vmem:[#allocation8 + $0x258] sm:$0xff] }
  0x2e   :  { %621 = vmatpush3.msra.mxu0 %v49_v23  ;;  %514 = vmatpush3.msra.mxu1 %v145_v30  ;;  %v273_v60 = vld [vmem:[#allocation8 + $0x2d0] sm:$0xff]  ;;  %v272_v62 = vld [vmem:[#allocation8 + $0x2c8] sm:$0xff]  ;;  %v255_v1 = vld [vmem:[#allocation8 + $0x240] sm:$0xff] }
  0x2f   :  { %622 = vmatprep.subr.mxu0 %v714_v0  ;;  %515 = vmatprep.subr.mxu1 %v160_v31  ;;  %v257_v61 = vld [vmem:[#allocation8 + $0x250] sm:$0xff]  ;;  %v256_v63 = vld [vmem:[#allocation8 + $0x248] sm:$0xff]  ;;  %v270_v2 = vld [vmem:[#allocation8 + $0x2b8] sm:$0xff] }
  0x30   :  { %623 = vmatpush3.msra.mxu0 %v48_v26  ;;  %516 = vmatpush3.msra.mxu1 %v144_v33  ;;  %v254_v3 = vld [vmem:[#allocation8 + $0x238] sm:$0xff]  ;;  %v269_v4 = vld [vmem:[#allocation8 + $0x2b0] sm:$0xff]  ;;  %v268_v6 = vld [vmem:[#allocation8 + $0x2a8] sm:$0xff] }
  0x31   :  { %624 = vmatprep.subr.mxu0 %v714_v0  ;;  %517 = vmatprep.subr.mxu1 %v159_v34  ;;  %v253_v5 = vld [vmem:[#allocation8 + $0x230] sm:$0xff]  ;;  %v252_v14 = vld [vmem:[#allocation8 + $0x228] sm:$0xff]  ;;  %v267_v15 = vld [vmem:[#allocation8 + $0x2a0] sm:$0xff] }
  0x32   :  { %625 = vmatpush3.msra.mxu0 %v47_v29  ;;  %518 = vmatpush3.msra.mxu1 %v143_v36  ;;  %v251_v16 = vld [vmem:[#allocation8 + $0x220] sm:$0xff]  ;;  %v266_v17 = vld [vmem:[#allocation8 + $0x298] sm:$0xff]  ;;  %v265_v19 = vld [vmem:[#allocation8 + $0x290] sm:$0xff] }
  0x33   :  { %626 = vmatprep.subr.mxu0 %v714_v0  ;;  %519 = vmatprep.subr.mxu1 %v158_v37  ;;  %v250_v18 = vld [vmem:[#allocation8 + $0x218] sm:$0xff]  ;;  %v249_v20 = vld [vmem:[#allocation8 + $0x210] sm:$0xff]  ;;  %v264_v21 = vld [vmem:[#allocation8 + $0x288] sm:$0xff] }
  0x34   :  { %627 = vmatpush3.msra.mxu0 %v46_v32  ;;  %520 = vmatpush3.msra.mxu1 %v142_v39  ;;  %v248_v22 = vld [vmem:[#allocation8 + $0x208] sm:$0xff]  ;;  %v263_v23 = vld [vmem:[#allocation8 + $0x280] sm:$0xff]  ;;  %v387_v25 = vld [vmem:[#allocation8 + $0x3f8] sm:$0xff] }
  0x35   :  { %628 = vmatprep.subr.mxu0 %v714_v0  ;;  %521 = vmatprep.subr.mxu1 %v157_v40  ;;  %v247_v24 = vld [vmem:[#allocation8 + $0x200] sm:$0xff]  ;;  %v371_v26 = vld [vmem:[#allocation8 + $0x378] sm:$0xff]  ;;  %v386_v27 = vld [vmem:[#allocation8 + $0x3f0] sm:$0xff] }
  0x36   :  { %629 = vmatpush3.msra.mxu0 %v45_v35  ;;  %236 = vmatprep.mubr.f32.mxu1 %v759_v42  ;;  %v370_v28 = vld [vmem:[#allocation8 + $0x370] sm:$0xff]  ;;  %v385_v29 = vld [vmem:[#allocation8 + $0x3e8] sm:$0xff]  ;;  %v384_v31 = vld [vmem:[#allocation8 + $0x3e0] sm:$0xff] }
  0x37   :  { %630 = vmatprep.subr.mxu0 %v714_v0  ;;  %522 = vmatpush3.msra.mxu1 %v141_v43  ;;  %v369_v30 = vld [vmem:[#allocation8 + $0x368] sm:$0xff]  ;;  %v368_v32 = vld [vmem:[#allocation8 + $0x360] sm:$0xff]  ;;  %v383_v33 = vld [vmem:[#allocation8 + $0x3d8] sm:$0xff] }
  0x38   :  { %631 = vmatpush3.msra.mxu0 %v44_v38  ;;  %523 = vmatprep.subr.mxu1 %v156_v44  ;;  %v367_v34 = vld [vmem:[#allocation8 + $0x358] sm:$0xff]  ;;  %v382_v35 = vld [vmem:[#allocation8 + $0x3d0] sm:$0xff]  ;;  %v381_v37 = vld [vmem:[#allocation8 + $0x3c8] sm:$0xff] }
  0x39   :  { %632 = vmatprep.subr.mxu0 %v714_v0  ;;  %524 = vmatpush3.msra.mxu1 %v140_v45  ;;  %v271_v0 = vld [vmem:[#allocation8 + $0x2c0] sm:$0xff]  ;;  %v366_v36 = vld [vmem:[#allocation8 + $0x350] sm:$0xff]  ;;  %v365_v38 = vld [vmem:[#allocation8 + $0x348] sm:$0xff] }
  0x3a   :  { %633 = vmatpush3.msra.mxu0 %v43_v41  ;;  %525 = vmatprep.subr.mxu1 %v155_v46  ;;  %v380_v39 = vld [vmem:[#allocation8 + $0x3c0] sm:$0xff]  ;;  %v379_v41 = vld [vmem:[#allocation8 + $0x3b8] sm:$0xff]  ;;  %v378_v43 = vld [vmem:[#allocation8 + $0x3b0] sm:$0xff] }
  0x3b   :  { %635 = vmatmul.mubr.f32.vlgmr.msra.gmra.mxu0 %v759_v42  ;;  %526 = vmatpush3.msra.mxu1 %v139_v47  ;;  %v364_v40 = vld [vmem:[#allocation8 + $0x340] sm:$0xff]  ;;  %v362_v44 = vld [vmem:[#allocation8 + $0x330] sm:$0xff]  ;;  %v377_v45 = vld [vmem:[#allocation8 + $0x3a8] sm:$0xff] }
  0x3c   :  { %345 = vmatprep.mubr.f32.mxu0 %v759_v42  ;;  %527 = vmatprep.subr.mxu1 %v154_v48 }
  0x3d   :  { %528 = vmatpush3.msra.mxu1 %v138_v49  ;;  %532 = vmatprep.subr.mxu0 %v278_v50 }
  0x3e   :  { %533 = vmatpush3.msra.mxu0 %v262_v51  ;;  %567 = vmatprep.subr.mxu1 %v387_v25 }
  0x3f   :  { %534 = vmatprep.subr.mxu0 %v277_v52  ;;  %v361_v52 = vld [vmem:[#allocation8 + $0x328] sm:$0xff] }
  0x40   :  { %535 = vmatpush3.msra.mxu0 %v261_v53  ;;  %v376_v53 = vld [vmem:[#allocation8 + $0x3a0] sm:$0xff] }
  0x41   :  { %536 = vmatprep.subr.mxu0 %v276_v54  ;;  %v360_v54 = vld [vmem:[#allocation8 + $0x320] sm:$0xff] }
  0x42   :  { %537 = vmatpush3.msra.mxu0 %v260_v55  ;;  %v375_v55 = vld [vmem:[#allocation8 + $0x398] sm:$0xff] }
  0x43   :  { %538 = vmatprep.subr.mxu0 %v275_v56  ;;  %v359_v56 = vld [vmem:[#allocation8 + $0x318] sm:$0xff] }
  0x44   :  { %539 = vmatpush3.msra.mxu0 %v259_v57  ;;  %v374_v57 = vld [vmem:[#allocation8 + $0x390] sm:$0xff] }
  0x45   :  { %540 = vmatprep.subr.mxu0 %v274_v58  ;;  %v358_v58 = vld [vmem:[#allocation8 + $0x310] sm:$0xff] }
  0x46   :  { %541 = vmatpush3.msra.mxu0 %v258_v59  ;;  %v373_v59 = vld [vmem:[#allocation8 + $0x388] sm:$0xff] }
  0x47   :  { %542 = vmatprep.subr.mxu0 %v273_v60  ;;  %v357_v60 = vld [vmem:[#allocation8 + $0x308] sm:$0xff] }
  0x48   :  { %543 = vmatpush3.msra.mxu0 %v257_v61  ;;  %v372_v61 = vld [vmem:[#allocation8 + $0x380] sm:$0xff] }
  0x49   :  { %544 = vmatprep.subr.mxu0 %v272_v62  ;;  %v356_v62 = vld [vmem:[#allocation8 + $0x300] sm:$0xff] }
  0x4a   :  { %545 = vmatpush3.msra.mxu0 %v256_v63 }
  0x4b   :  { %546 = vmatprep.subr.mxu0 %v271_v0 }
  0x4c   :  { %547 = vmatpush3.msra.mxu0 %v255_v1 }
  0x4d   :  { %548 = vmatprep.subr.mxu0 %v270_v2 }
  0x4e   :  { %549 = vmatpush3.msra.mxu0 %v254_v3 }
  0x4f   :  { %550 = vmatprep.subr.mxu0 %v269_v4 }
  0x50   :  { %551 = vmatpush3.msra.mxu0 %v253_v5 }
  0x51   :  { %552 = vmatprep.subr.mxu0 %v268_v6 }
  0x52   :  { %553 = vmatpush3.msra.mxu0 %v252_v14 }
  0x53   :  { %554 = vmatprep.subr.mxu0 %v267_v15 }
  0x54   :  { %555 = vmatpush3.msra.mxu0 %v251_v16 }
  0x55   :  { %556 = vmatprep.subr.mxu0 %v266_v17 }
  0x56   :  { %557 = vmatpush3.msra.mxu0 %v250_v18 }
  0x57   :  { %558 = vmatprep.subr.mxu0 %v265_v19 }
  0x58   :  { %559 = vmatpush3.msra.mxu0 %v249_v20 }
  0x59   :  { %560 = vmatprep.subr.mxu0 %v264_v21 }
  0x5a   :  { %561 = vmatpush3.msra.mxu0 %v248_v22 }
  0x5b   :  { %562 = vmatprep.subr.mxu0 %v263_v23 }
  0x5c   :  { %563 = vmatpush3.msra.mxu0 %v247_v24 }
  0xfb   :  { %v126_v8 = vpop.f32.mrf.mxu0 }
  0xfc   :  { %v132_v10 = vmax.f32 %v768_v7, %v126_v8 }
  0xfd   :  { %v636_v11 = vpop.f32.mrf.mxu0 }
  0xfe   :  { %v134_v12 = vmin.f32 %v773_v9, %v132_v10 }
 0x100   :  { %v135_v13 = vsub.f32 %v126_v8, %v134_v12 }
 0x102   :  { %237 = vmatmul.mubr.f32.vlgmr.msra.gmra.mxu1 %v135_v13 }
 0x103   :  { %454 = vmatprep.mubr.f32.mxu1 %v759_v42  ;;  %568 = vmatpush3.msra.mxu1 %v371_v26  ;;  %v363_v42 = vld [vmem:[#allocation8 + $0x338] sm:$0xff] }
 0x104   :  { %569 = vmatprep.subr.mxu1 %v386_v27 }
 0x105   :  { %570 = vmatpush3.msra.mxu1 %v370_v28 }
 0x106   :  { %571 = vmatprep.subr.mxu1 %v385_v29 }
 0x107   :  { %572 = vmatpush3.msra.mxu1 %v369_v30 }
 0x108   :  { %573 = vmatprep.subr.mxu1 %v384_v31 }
 0x109   :  { %574 = vmatpush3.msra.mxu1 %v368_v32 }
 0x10a   :  { %575 = vmatprep.subr.mxu1 %v383_v33 }
 0x10b   :  { %576 = vmatpush3.msra.mxu1 %v367_v34 }
 0x10c   :  { %577 = vmatprep.subr.mxu1 %v382_v35 }
 0x10d   :  { %578 = vmatpush3.msra.mxu1 %v366_v36 }
 0x10e   :  { %579 = vmatprep.subr.mxu1 %v381_v37 }
 0x10f   :  { %580 = vmatpush3.msra.mxu1 %v365_v38 }
 0x110   :  { %581 = vmatprep.subr.mxu1 %v380_v39 }
 0x111   :  { %582 = vmatpush3.msra.mxu1 %v364_v40 }
 0x112   :  { %583 = vmatprep.subr.mxu1 %v379_v41 }
 0x113   :  { %584 = vmatpush3.msra.mxu1 %v363_v42 }
 0x114   :  { %585 = vmatprep.subr.mxu1 %v378_v43 }
 0x115   :  { %586 = vmatpush3.msra.mxu1 %v362_v44 }
 0x116   :  { %587 = vmatprep.subr.mxu1 %v377_v45 }
 0x117   :  { %588 = vmatpush3.msra.mxu1 %v361_v52 }
 0x118   :  { %589 = vmatprep.subr.mxu1 %v376_v53 }
 0x119   :  { %590 = vmatpush3.msra.mxu1 %v360_v54 }
 0x11a   :  { %591 = vmatprep.subr.mxu1 %v375_v55 }
 0x11b   :  { %592 = vmatpush3.msra.mxu1 %v359_v56 }
 0x11c   :  { %593 = vmatprep.subr.mxu1 %v374_v57 }
 0x11d   :  { %594 = vmatpush3.msra.mxu1 %v358_v58 }
 0x11e   :  { %595 = vmatprep.subr.mxu1 %v373_v59 }
 0x11f   :  { %596 = vmatpush3.msra.mxu1 %v357_v60 }
 0x120   :  { %597 = vmatprep.subr.mxu1 %v372_v61 }
 0x121   :  { %598 = vmatpush3.msra.mxu1 %v356_v62 }
 0x1c2   :  { %v529_v46 = vpop.f32.mrf.mxu1 }
 0x1c4   :  { %v530_v47 = vpop.f32.mrf.mxu1 }
 0x1c5   :  { %v531_v48 = vadd.f32 %v530_v47, %v529_v46 }
 0x1c7   :  { %v242_v49 = vmax.f32 %v768_v7, %v531_v48 }
 0x1c9   :  { %v243_v50 = vmin.f32 %v773_v9, %v242_v49 }
 0x1cb   :  { %v244_v51 = vsub.f32 %v531_v48, %v243_v50 }
 0x1cd   :  { %346 = vmatmul.mubr.f32.vlgmr.msra.gmra.mxu0 %v244_v51 }
 0x28d   :  { %v564_v63 = vpop.f32.mrf.mxu0 }
 0x28f   :  { %v565_v0 = vpop.f32.mrf.mxu0 }
 0x290   :  { %v566_v1 = vadd.f32 %v565_v0, %v564_v63 }
 0x292   :  { %v351_v2 = vmax.f32 %v768_v7, %v566_v1 }
 0x294   :  { %v352_v3 = vmin.f32 %v773_v9, %v351_v2 }
 0x296   :  { %v353_v4 = vsub.f32 %v566_v1, %v352_v3 }
 0x298   :  { %455 = vmatmul.mubr.f32.vlgmr.msra.gmra.mxu1 %v353_v4 }
 0x358   :  { %v599_v5 = vpop.f32.mrf.mxu1 }
 0x35a   :  { %v600_v6 = vpop.f32.mrf.mxu1 }
 0x35b   :  { %v601_v8 = vadd.f32 %v600_v6, %v599_v5 }
 0x35d   :  { %v460_v10 = vmax.f32 %v768_v7, %v601_v8 }
 0x35f   :  { %v461_v11 = vmin.f32 %v773_v9, %v460_v10 }
 0x361   :  { %v462_v12 = vsub.f32 %v601_v8, %v461_v11 }
 0x363   :  { %463 = vst [vmem:[#allocation10] sm:$0xff] %v462_v12 }
 0x364   :  { %695 = shalt.err (!%p692_p0)
}
 0x365   :  { %473 = dma.vmem_to_hbm [thread:$0]  %s471_s27, 128, %s790_s3, [#allocation7]  }
 0x366   :  { %708 = dma.done.wait [#allocation7], 128  }
 0x367   :  { %709 = vsyncadd [#allocation7], 4294967168 }
 0x368   :  { %477 = vsyncpa [#allocation6], 1 }
 0x369   :  { %478 = vsyncpa [#allocation9], 1 }
 0x36a   :  { %479 = vsyncpa [#allocation7], 1 }

</bundles_post_ra>
